<compile_context>
chip_gen: v7x
topology: tpu7x:2x2x1
jax: 0.10.0
libtpu: 0.0.40
codegen_flags: <defaults>
</compile_context>

<pallas_src>
import functools

import jax
import jax.numpy as jnp
from jax.experimental import pallas as pl
from jax.experimental.pallas import tpu as pltpu


def _round_up(x, m):
    return ((x + m - 1) // m) * m


def _patch_embed_kernel(x_ref, w_ref, b_ref, o_ref, *, e_real, layer_norm, eps=1e-6):
    # x_ref: (TM, K) bf16, w_ref: (K, Ep) bf16, b_ref: (1, Ep) f32, o_ref: (TM, Ep)
    acc = jnp.dot(x_ref[...], w_ref[...], preferred_element_type=jnp.float32)
    acc = acc + b_ref[...]

    if layer_norm:
        # nn.LayerNorm(embed_dim, elementwise_affine=False, eps=1e-6)
        e_pad = acc.shape[-1]
        if e_pad == e_real:
            mu = jnp.mean(acc, axis=-1, keepdims=True)
            var = jnp.mean(jnp.square(acc - mu), axis=-1, keepdims=True)
        else:
            # Padded lanes are exactly zero (zero-padded weight cols / bias); mask
            # them out of the statistics so they do not skew mean/variance.
            lane = jax.lax.broadcasted_iota(jnp.int32, acc.shape, 1)
            maskf = (lane < e_real).astype(jnp.float32)
            inv_e = 1.0 / float(e_real)
            mu = jnp.sum(acc * maskf, axis=-1, keepdims=True) * inv_e
            var = jnp.sum(jnp.square((acc - mu) * maskf), axis=-1, keepdims=True) * inv_e
        acc = (acc - mu) * jax.lax.rsqrt(var + eps)

    o_ref[...] = acc.astype(o_ref.dtype)


def _pick_tile_m(m, k, e_pad, in_itemsize, tile_m, out_itemsize=4,
                 budget_bytes=14 * 1024 * 1024):
    """Largest M-tile (<= tile_m, multiple of 8) whose double-buffered VMEM fits."""
    tm = min(int(tile_m), _round_up(m, 8))
    tm = max(8, (tm // 8) * 8)

    def usage(t):
        # 2x (double buffer) * (patches tile + output tile) + resident weight/bias.
        return (2 * (t * k * in_itemsize + t * e_pad * out_itemsize)
                + k * e_pad * in_itemsize + e_pad * 4)

    while tm > 8 and usage(tm) > budget_bytes:
        tm = max(8, ((tm // 2) // 8) * 8)
    return tm


def patch_embed_2d(latent, weight, bias, patch_size, layer_norm=False, flatten=True,
                   tile_m=1024, compute_dtype=jnp.bfloat16):
    """Pallas implementation of PatchEmbed2D.forward.

    latent : (b, c, t, h, w) float32
    weight : (embed_dim, c, p, p)   (PyTorch Conv2d layout)
    bias   : (embed_dim,)
    returns: (b, t * (h//p) * (w//p), embed_dim)
    """
    b, c, t, h, w = latent.shape
    e = weight.shape[0]
    p = patch_size
    nh, nw = h // p, w // p
    m = b * t * nh * nw
    k = c * p * p

    # --- glue: 'b c t h w -> (b t) c h w' + non-overlapping patch extraction ---
    x = jnp.transpose(latent, (0, 2, 1, 3, 4)).reshape(b * t, c, h, w)
    x = x.reshape(b * t, c, nh, p, nw, p)
    x = jnp.transpose(x, (0, 2, 4, 1, 3, 5))            # (bt, nh, nw, c, p, p)
    patches = x.reshape(m, k).astype(compute_dtype)

    # --- lane-dense output padding (E -> multiple of 128); K left unpadded ------
    e_pad = _round_up(e, 128)

    w2d = weight.reshape(e, k).T.astype(compute_dtype)   # (K, E)
    if e_pad != e:
        w2d = jnp.pad(w2d, ((0, 0), (0, e_pad - e)))
    b2d = bias.astype(jnp.float32)
    if e_pad != e:
        b2d = jnp.pad(b2d, (0, e_pad - e))
    b2d = b2d.reshape(1, e_pad)

    # --- M tiling: TM multiple of 8 (VMEM-budgeted), M padded to multiple of TM --
    in_itemsize = jnp.dtype(compute_dtype).itemsize
    tm = _pick_tile_m(m, k, e_pad, in_itemsize, tile_m)
    m_pad = _round_up(m, tm)
    if m_pad != m:
        patches = jnp.pad(patches, ((0, m_pad - m), (0, 0)))

    grid = (m_pad // tm,)

    cost = pl.CostEstimate(
        flops=2 * m_pad * k * e_pad,
        transcendentals=0,
        bytes_accessed=(m_pad * k * in_itemsize         # patches read
                        + k * e_pad * in_itemsize       # weight read
                        + e_pad * 4                     # bias read
                        + m_pad * e_pad * 4),           # output write
    )

    kernel = functools.partial(_patch_embed_kernel, e_real=e, layer_norm=layer_norm)

    out = pl.pallas_call(
        kernel,
        out_shape=jax.ShapeDtypeStruct((m_pad, e_pad), latent.dtype),
        grid_spec=pltpu.PrefetchScalarGridSpec(
            num_scalar_prefetch=0,
            grid=grid,
            in_specs=[
                pl.BlockSpec((tm, k), lambda i: (i, 0)),         # patches tile
                pl.BlockSpec((k, e_pad), lambda i: (0, 0)),      # weight (resident)
                pl.BlockSpec((1, e_pad), lambda i: (0, 0)),      # bias (resident)
            ],
            out_specs=pl.BlockSpec((tm, e_pad), lambda i: (i, 0)),
        ),
        compiler_params=pltpu.CompilerParams(
            dimension_semantics=("parallel",)),
        cost_estimate=cost,
    )(patches, w2d, b2d)

    if (m_pad != m) or (e_pad != e):
        out = out[:m, :e]

    if not flatten:
        # TODO(synk): the original forward's final rearrange is only valid for the
        # flatten=True path; return the conv-layout tensor here.
        out = out.reshape(b * t, nh, nw, e)
        return jnp.transpose(out, (0, 3, 1, 2))

    # '(b t) n c -> b (t n) c'
    return out.reshape(b, t * nh * nw, e)


def _reference(latent, weight, bias, patch_size, layer_norm=False):
    """Plain-JAX f32 reference matching the PyTorch module (conv -> flatten -> rearrange)."""
    b, c, t, h, w = latent.shape
    e = weight.shape[0]
    p = patch_size
    x = jnp.transpose(latent, (0, 2, 1, 3, 4)).reshape(b * t, c, h, w)
    y = jax.lax.conv_general_dilated(
        x, weight, window_strides=(p, p), padding="VALID",
        dimension_numbers=("NCHW", "OIHW", "NCHW"))
    y = y + bias.reshape(1, e, 1, 1)
    bt, _, nh, nw = y.shape
    y = y.reshape(bt, e, nh * nw).transpose(0, 2, 1)    # flatten(2).transpose(1,2)
    if layer_norm:
        mu = jnp.mean(y, axis=-1, keepdims=True)
        var = jnp.mean(jnp.square(y - mu), axis=-1, keepdims=True)
        y = (y - mu) * jax.lax.rsqrt(var + 1e-6)
    return y.reshape(b, t * nh * nw, e)


if __name__ == "__main__":
    # Small shapes consistent with the module's forward.
    B, C, T, H, W = 2, 4, 2, 16, 16
    PATCH = 4
    EMBED = 32

    key = jax.random.PRNGKey(0)
    k_lat, k_w, k_b = jax.random.split(key, 3)

    latent = jax.random.normal(k_lat, (B, C, T, H, W), dtype=jnp.float32)
    weight = jax.random.normal(k_w, (EMBED, C, PATCH, PATCH), dtype=jnp.float32) * 0.02
    bias = jax.random.normal(k_b, (EMBED,), dtype=jnp.float32) * 0.02

    # Default module path: layer_norm=False, flatten=True.
    out = jax.block_until_ready(patch_embed_2d(latent, weight, bias, PATCH))
    ref = jax.block_until_ready(_reference(latent, weight, bias, PATCH))
    assert out.shape == (B, T * (H // PATCH) * (W // PATCH), EMBED), out.shape
    # bf16 matmul operands (f32 accumulation) -> tolerance loosened vs pure-f32.
    assert jnp.allclose(out, ref, atol=1e-2, rtol=1e-2), float(jnp.max(jnp.abs(out - ref)))

    # Also exercise the layer_norm=True branch (elementwise_affine-free LayerNorm,
    # with E padded 32 -> 128 so the masked-statistics path runs).
    out_ln = jax.block_until_ready(
        patch_embed_2d(latent, weight, bias, PATCH, layer_norm=True))
    ref_ln = jax.block_until_ready(
        _reference(latent, weight, bias, PATCH, layer_norm=True))
    assert jnp.allclose(out_ln, ref_ln, atol=5e-2, rtol=5e-2), \
        float(jnp.max(jnp.abs(out_ln - ref_ln)))

    print("KERNEL_OK")
</pallas_src>

<mosaic_0001>
module attributes {stable_mosaic.version = 11 : i64} {
  func.func @_patch_embed_kernel(%arg0: i32, %arg1: memref<64x64xbf16, #tpu.memory_space<vmem>>, %arg2: memref<64x128xbf16, #tpu.memory_space<vmem>>, %arg3: memref<1x128xf32, #tpu.memory_space<vmem>>, %arg4: memref<64x128xf32, #tpu.memory_space<vmem>>) attributes {dimension_semantics = [#tpu.dimension_semantics<parallel>], iteration_bounds = array<i64: 1>, scalar_prefetch = 0 : i64, scratch_operands = 0 : i64, tpu.core_type = #tpu.core_type<tc>, window_params = [{transform_indices = @transform_0, window_bounds = array<i64: 64, 64>}, {pipeline_mode = #tpu.pipeline_mode<synchronous>, transform_indices = @transform_1, window_bounds = array<i64: 64, 128>}, {pipeline_mode = #tpu.pipeline_mode<synchronous>, transform_indices = @transform_2, window_bounds = array<i64: 1, 128>}, {transform_indices = @transform_3, window_bounds = array<i64: 64, 128>}]} {
    %c0 = arith.constant 0 : index
    %c0_0 = arith.constant 0 : index
    %0 = vector.load %arg1[%c0, %c0_0] : memref<64x64xbf16, #tpu.memory_space<vmem>>, vector<64x64xbf16>
    %c0_1 = arith.constant 0 : index
    %c0_2 = arith.constant 0 : index
    %1 = vector.load %arg2[%c0_1, %c0_2] : memref<64x128xbf16, #tpu.memory_space<vmem>>, vector<64x128xbf16>
    %cst = arith.constant dense<0.000000e+00> : vector<64x128xf32>
    %2 = tpu.matmul %0, %1, %cst {dimension_numbers = #tpu.dot_dimension_numbers<[1], [0], [0], [1], [0, 0, 1, 1], [], []>} : vector<64x64xbf16>, vector<64x128xbf16>, vector<64x128xf32> -> vector<64x128xf32>
    %c0_3 = arith.constant 0 : index
    %c0_4 = arith.constant 0 : index
    %3 = vector.load %arg3[%c0_3, %c0_4] : memref<1x128xf32, #tpu.memory_space<vmem>>, vector<1x128xf32>
    %4 = vector.broadcast %3 : vector<1x128xf32> to vector<64x128xf32>
    %5 = arith.addf %2, %4 : vector<64x128xf32>
    %c0_5 = arith.constant 0 : index
    %c0_6 = arith.constant 0 : index
    %6 = vector.load %arg4[%c0_5, %c0_6] : memref<64x128xf32, #tpu.memory_space<vmem>>, vector<64x128xf32>
    tpu.vector_store %arg4[%c0_5, %c0_6], %5 {strides = array<i32>} : memref<64x128xf32, #tpu.memory_space<vmem>>, vector<64x128xf32>,
    return
  }
  func.func @transform_0(%arg0: i32) -> (i32, i32) {
    %c0_i32 = arith.constant 0 : i32
    %c0_i32_0 = arith.constant 0 : i32
    return %arg0, %c0_i32 : i32, i32
  }
  func.func @transform_1(%arg0: i32) -> (i32, i32) {
    %c0_i32 = arith.constant 0 : i32
    %c0_i32_0 = arith.constant 0 : i32
    %c0_i32_1 = arith.constant 0 : i32
    return %c0_i32, %c0_i32_0 : i32, i32
  }
  func.func @transform_2(%arg0: i32) -> (i32, i32) {
    %c0_i32 = arith.constant 0 : i32
    %c0_i32_0 = arith.constant 0 : i32
    %c0_i32_1 = arith.constant 0 : i32
    return %c0_i32, %c0_i32_0 : i32, i32
  }
  func.func @transform_3(%arg0: i32) -> (i32, i32) {
    %c0_i32 = arith.constant 0 : i32
    %c0_i32_0 = arith.constant 0 : i32
    return %arg0, %c0_i32 : i32, i32
  }
}

</mosaic_0001>

<bundles_post_ra>
// kernel: tpu_custom_call.1
= control target key start
LH: loop header
LB: loop body
LE: loop exit
PB: predicated region body
PF: predicated region fallthrough
CT: control target
= control target key end

     0   :  { %8 = vsyncpa [#allocation3], 0  ;;  %s417_s0 = inlined_call_operand.hbm [shape: bf16[64,64], index: 0, kind: input, shape index: {}]   ;;  %s418_s1 = inlined_call_operand.hbm [shape: bf16[64,128], index: 1, kind: input, shape index: {}]   ;;  %s419_s2 = inlined_call_operand.vmem [shape: f32[1,128], index: 2, kind: input, shape index: {}]   ;;  %s420_s3 = inlined_call_operand.hbm [shape: f32[64,128], index: 3, kind: output, shape index: {}]  }
   0x1   :  { %9 = vsyncpa [#allocation6], 0 }
   0x2   :  { %10 = vsyncpa [#allocation4], 0  ;;  %s347_s12 = smov [#allocation2]   ;;  %s275_s16 = scalar_lea.hbm %s417_s0, 512 }
   0x3   :  { %s16_s13 = sshll.u32 %s347_s12, 4  ;;  %p276_p0 = scmp.ne.s32.totalorder %s417_s0, %s275_s16  ;;  %s17_s13 = int_to_ptr.vmem [resolvable:$true] %s16_s13 }
   0x4   :  { %p279_p1 = scmp.lt.u32.totalorder %s275_s16, %s417_s0 }
   0x6   :  { %p281_p2 = pnand %p279_p1, %p276_p0 }
   0x8   :  { %284 = shalt.err (!%p281_p2)
}
   0x9   :  { %s285_s21 = scalar_lea.vmem %s17_s13, 512  ;;  %p290_p4 = scmp.lt.s32.totalorder %s17_s13, %s17_s13 }
   0xa   :  { %p286_p3 = scmp.ne.s32.totalorder %s17_s13, %s285_s21  ;;  %p291_p5 = scmp.lt.s32.totalorder %s285_s21, %s285_s21 }
   0xc   :  { %p292_p6 = por %p291_p5, %p290_p4 }
   0xe   :  { %p293_p7 = pnand %p292_p6, %p286_p3 }
  0x10   :  { %296 = shalt.err (!%p293_p7)
}
  0x11   :  { %s348_s22 = smov 64   ;;  %s349_s23 = smov 4  }
  0x12   :  { %22 = dma.hbm_to_vmem [thread:$0]  %s417_s0, 512, %s17_s13, [#allocation3], %s348_s22, %s348_s22, %s349_s23  }
  0x13   :  { %s350_s26 = smov [#allocation5]   ;;  %s297_s30 = scalar_lea.hbm %s418_s1, 512 }
  0x14   :  { %s28_s27 = sshll.u32 %s350_s26, 4  ;;  %p298_p8 = scmp.ne.s32.totalorder %s418_s1, %s297_s30  ;;  %s29_s27 = int_to_ptr.vmem [resolvable:$true] %s28_s27 }
  0x15   :  { %p301_p9 = scmp.lt.u32.totalorder %s297_s30, %s418_s1 }
  0x17   :  { %p303_p10 = pnand %p301_p9, %p298_p8 }
  0x19   :  { %306 = shalt.err (!%p303_p10)
}
  0x1a   :  { %s307_s8 = scalar_lea.vmem %s29_s27, 512  ;;  %p312_p12 = scmp.lt.s32.totalorder %s29_s27, %s29_s27 }
  0x1b   :  { %p308_p11 = scmp.ne.s32.totalorder %s29_s27, %s307_s8  ;;  %p313_p13 = scmp.lt.s32.totalorder %s307_s8, %s307_s8 }
  0x1d   :  { %p314_p0 = por %p313_p13, %p312_p12 }
  0x1f   :  { %p315_p1 = pnand %p314_p0, %p308_p11 }
  0x21   :  { %318 = shalt.err (!%p315_p1)
}
  0x22   :  { %34 = dma.hbm_to_vmem [thread:$0]  %s418_s1, 512, %s29_s27, [#allocation6], %s348_s22, %s348_s22, %s349_s23  }
  0x23   :  { %341 = dma.done.wait [#allocation3], 512  }
  0x24   :  { %342 = vsyncadd [#allocation3], 4294966784 }
  0x25   :  { %343 = dma.done.wait [#allocation6], 512  }
  0x26   :  { %344 = vsyncadd [#allocation6], 4294966784  ;;  %v267_v0 = vld [vmem:[#allocation5] sm:$0xff]   ;;  %v268_v1 = vld [vmem:[#allocation5 + $0x8] sm:$0xff]   ;;  %vm111_vm0 = vcmask 523264   ;;  %s351_s11 = smov [#allocation7]  }
  0x27   :  { %236 = vmatprep.subr.bf16.mxu0 %v267_v0  ;;  %252 = vmatprep.subr.bf16.mxu1 %v267_v0  ;;  %v269_v2 = vld [vmem:[#allocation5 + $0x10] sm:$0xff]   ;;  %v271_v3 = vld [vmem:[#allocation2] sm:$0xff]   ;;  %v270_v5 = vld [vmem:[#allocation5 + $0x18] sm:$0xff]   ;;  %s202_s12 = sshll.u32 %s351_s11, 4  ;;  %s203_s12 = int_to_ptr.vmem [resolvable:$true] %s202_s12 }
  0x28   :  { %237 = vmatpush3.bf16.msra.mxu0 %v267_v0  ;;  %256 = vmatpush3.bf16.msra.mxu1 %v267_v0  ;;  %v272_v4 = vld [vmem:[#allocation2 + $0x10] sm:$0xff]   ;;  %v273_v6 = vld [vmem:[#allocation2 + $0x8] sm:$0xff]   ;;  %v274_v7 = vld [vmem:[#allocation2 + $0x18] sm:$0xff]   ;;  %p324_p3 = scmp.lt.s32.totalorder %s203_s12, %s203_s12 }
  0x29   :  { %238 = vmatprep.subr.bf16.mxu0 %v268_v1  ;;  %253 = vmatprep.subr.bf16.mxu1 %v268_v1  ;;  %v215_v8 = vld [vmem:[%s419_s2] ss:$0 sm:$0xff]  ;;  %s319_s2 = scalar_lea.vmem %s203_s12, 1024 }
  0x2a   :  { %244 = vmatprep.mubr.msk.bf16.mxu0 %vm111_vm0, %v271_v3  ;;  %248 = vmatprep.mubr.msk.bf16.mxu1 %vm111_vm0, %v272_v4  ;;  %p320_p2 = scmp.ne.s32.totalorder %s203_s12, %s319_s2  ;;  %p325_p4 = scmp.lt.s32.totalorder %s319_s2, %s319_s2 }
  0x2c   :  { %239 = vmatpush3.bf16.msra.mxu0 %v268_v1  ;;  %257 = vmatpush3.bf16.msra.mxu1 %v268_v1  ;;  %p326_p5 = por %p325_p4, %p324_p3 }
  0x2d   :  { %240 = vmatprep.subr.bf16.mxu0 %v269_v2  ;;  %254 = vmatprep.subr.bf16.mxu1 %v269_v2 }
  0x2e   :  { %p327_p6 = pnand %p326_p5, %p320_p2 }
  0x30   :  { %241 = vmatpush3.bf16.msra.mxu0 %v269_v2  ;;  %258 = vmatpush3.bf16.msra.mxu1 %v269_v2 }
  0x31   :  { %242 = vmatprep.subr.bf16.mxu0 %v270_v5  ;;  %255 = vmatprep.subr.bf16.mxu1 %v270_v5 }
  0x34   :  { %243 = vmatpush3.bf16.msra.mxu0 %v270_v5  ;;  %259 = vmatpush3.bf16.msra.mxu1 %v270_v5 }
  0x37   :  { %245 = vmatmul.mubr.msk.bf16.vlgmr.msra.gmra.mrb[0].mxu0 %vm111_vm0, %v273_v6  ;;  %249 = vmatmul.mubr.msk.bf16.vlgmr.msra.gmra.mrb[0].mxu1 %vm111_vm0, %v274_v7 }
 0x10a   :  { %v246_v9 = vpop.f32.mrb[0].mxu0  ;;  %v250_v10 = vpop.f32.mrb[0].mxu1 }
 0x10b   :  { %v167_v11 = vadd.f32 %v246_v9, %v215_v8  ;;  %v183_v12 = vadd.f32 %v250_v10, %v215_v8  ;;  %v158_v13 = vpop.f32.mrb[1].mxu0  ;;  %v174_v14 = vpop.f32.mrb[1].mxu1 }
 0x10c   :  { %v159_v15 = vadd.f32 %v215_v8, %v158_v13  ;;  %v175_v16 = vadd.f32 %v215_v8, %v174_v14  ;;  %v247_v17 = vpop.f32.mrb[2].mxu0  ;;  %v251_v18 = vpop.f32.mrb[2].mxu1 }
 0x10d   :  { %191 = vst [vmem:[#allocation7 + $0x10] sm:$0xff] %v167_v11  ;;  %195 = vst [vmem:[#allocation7 + $0x30] sm:$0xff] %v183_v12  ;;  %v170_v19 = vadd.f32 %v247_v17, %v215_v8  ;;  %v186_v20 = vadd.f32 %v251_v18, %v215_v8  ;;  %v161_v21 = vpop.f32.mrb[3].mxu0  ;;  %v177_v22 = vpop.f32.mrb[3].mxu1 }
 0x10e   :  { %189 = vst [vmem:[#allocation7] sm:$0xff] %v159_v15  ;;  %193 = vst [vmem:[#allocation7 + $0x20] sm:$0xff] %v175_v16  ;;  %v162_v23 = vadd.f32 %v215_v8, %v161_v21  ;;  %v178_v24 = vadd.f32 %v215_v8, %v177_v22 }
 0x10f   :  { %192 = vst [vmem:[#allocation7 + $0x18] sm:$0xff] %v170_v19  ;;  %196 = vst [vmem:[#allocation7 + $0x38] sm:$0xff] %v186_v20 }
 0x110   :  { %190 = vst [vmem:[#allocation7 + $0x8] sm:$0xff] %v162_v23  ;;  %194 = vst [vmem:[#allocation7 + $0x28] sm:$0xff] %v178_v24 }
 0x111   :  { %330 = shalt.err (!%p327_p6)
}
 0x112   :  { %s331_s15 = scalar_lea.hbm %s420_s3, 1024 }
 0x113   :  { %p332_p7 = scmp.ne.s32.totalorder %s420_s3, %s331_s15  ;;  %p335_p8 = scmp.lt.u32.totalorder %s331_s15, %s420_s3 }
 0x115   :  { %p337_p9 = pnand %p335_p8, %p332_p7 }
 0x117   :  { %340 = shalt.err (!%p337_p9)
}
 0x118   :  { %s352_s20 = smov 128   ;;  %s353_s21 = smov 8  }
 0x119   :  { %208 = dma.vmem_to_hbm [thread:$0]  %s203_s12, 1024, %s420_s3, [#allocation4], %s352_s20, %s352_s20, %s353_s21  }
 0x11a   :  { %345 = dma.done.wait [#allocation4], 1024  }
 0x11b   :  { %346 = vsyncadd [#allocation4], 4294966272 }
 0x11c   :  { %212 = vsyncpa [#allocation3], 1 }
 0x11d   :  { %213 = vsyncpa [#allocation6], 1 }
 0x11e   :  { %214 = vsyncpa [#allocation4], 1 }

</bundles_post_ra>
